<compile_context>
chip_gen: v5e
topology: v5e:2x2
jax: 0.10.0
libtpu: 0.0.40
codegen_flags: <defaults>
</compile_context>

<pallas_src>
import jax
import jax.numpy as jnp
from jax.experimental import pallas as pl
from jax.experimental.pallas import tpu as pltpu

LANE = 128      # TPU lane width
TB_MAX = 512    # max batch tile (multiple of 8; VMEM use at this size is tiny)


def dqn_kernel(x_ref, w1_ref, b1_ref, w2_ref, b2_ref, w3_ref, b3_ref, o_ref):
    # layer1 + ReLU   (K = n_obs is tiny; this layer is latency-, not FLOP-bound)
    h1 = jnp.dot(x_ref[...], w1_ref[...], preferred_element_type=jnp.float32)
    h1 = jnp.maximum(h1 + b1_ref[...], 0.0)
    # layer2 + ReLU
    h2 = jnp.dot(h1, w2_ref[...], preferred_element_type=jnp.float32)
    h2 = jnp.maximum(h2 + b2_ref[...], 0.0)
    # layer3 (no activation) -> lane-dense (TB, 128) padded output slab
    o_ref[...] = (
        jnp.dot(h2, w3_ref[...], preferred_element_type=jnp.float32) + b3_ref[...]
    )


def _round_up(x, m):
    return ((x + m - 1) // m) * m


def dqn_forward(x, params, *, tb_max=TB_MAX):
    """x: (B, n_observations) f32.  Returns (B, n_actions) f32."""
    w1, b1, w2, b2, w3, b3 = params
    B, n_obs = x.shape
    hidden = w1.shape[1]
    n_actions = w3.shape[1]

    # --- lane-dense output padding: pad layer-3 columns to a multiple of 128 ---
    n_pad = max(LANE, _round_up(n_actions, LANE))
    w3p = jnp.zeros((hidden, n_pad), jnp.float32).at[:, :n_actions].set(w3)
    b3p = jnp.zeros((1, n_pad), jnp.float32).at[:, :n_actions].set(b3)

    # --- adaptive batch tile: small batches -> one tiny tile, big batches -> 512 ---
    tb = min(tb_max, _round_up(B, 8))
    n_tiles = pl.cdiv(B, tb)
    B_pad = n_tiles * tb
    if B_pad != B:
        x = jnp.pad(x, ((0, B_pad - B), (0, 0)))

    vmem = pltpu.MemorySpace.VMEM

    out = pl.pallas_call(
        dqn_kernel,
        out_shape=jax.ShapeDtypeStruct((B_pad, n_pad), jnp.float32),
        grid=(n_tiles,),
        in_specs=[
            # batch-tiled activations (pipelined / double-buffered across the grid)
            pl.BlockSpec((tb, n_obs), lambda i: (i, 0), memory_space=vmem),
            # weights / biases: same block every step -> stay VMEM-resident
            pl.BlockSpec(w1.shape, lambda i: (0, 0), memory_space=vmem),
            pl.BlockSpec(b1.shape, lambda i: (0, 0), memory_space=vmem),
            pl.BlockSpec(w2.shape, lambda i: (0, 0), memory_space=vmem),
            pl.BlockSpec(b2.shape, lambda i: (0, 0), memory_space=vmem),
            pl.BlockSpec(w3p.shape, lambda i: (0, 0), memory_space=vmem),
            pl.BlockSpec(b3p.shape, lambda i: (0, 0), memory_space=vmem),
        ],
        out_specs=pl.BlockSpec((tb, n_pad), lambda i: (i, 0), memory_space=vmem),
        compiler_params=pltpu.CompilerParams(
            dimension_semantics=("parallel",),   # shard batch tiles across TCs (v7x)
        ),
    )(x, w1, b1, w2, b2, w3p, b3p)

    # drop batch padding and the zero-padded action columns
    return out[:B, :n_actions]


def init_linear(key, fan_in, fan_out):
    # Mimic torch.nn.Linear default init: U(-1/sqrt(fan_in), 1/sqrt(fan_in))
    kw, kb = jax.random.split(key)
    bound = 1.0 / jnp.sqrt(jnp.float32(fan_in))
    w = jax.random.uniform(kw, (fan_in, fan_out), jnp.float32, -bound, bound)
    b = jax.random.uniform(kb, (1, fan_out), jnp.float32, -bound, bound)
    return w, b


def make_params(key, n_observations, n_actions, hidden=128):
    k1, k2, k3 = jax.random.split(key, 3)
    w1, b1 = init_linear(k1, n_observations, hidden)
    w2, b2 = init_linear(k2, hidden, hidden)
    w3, b3 = init_linear(k3, hidden, n_actions)
    return (w1, b1, w2, b2, w3, b3)


def reference_forward(x, params):
    w1, b1, w2, b2, w3, b3 = params
    h = jnp.maximum(x @ w1 + b1, 0.0)
    h = jnp.maximum(h @ w2 + b2, 0.0)
    return h @ w3 + b3


if __name__ == "__main__":
    key = jax.random.PRNGKey(0)
    k_params, k_x = jax.random.split(key)

    n_observations = 4   # e.g. CartPole observation dim
    n_actions = 2        # e.g. CartPole action dim
    batch = 256          # replay-buffer-sized batch (single 256-row tile)

    params = make_params(k_params, n_observations, n_actions)
    x = jax.random.normal(k_x, (batch, n_observations), jnp.float32)

    out = dqn_forward(x, params)
    out = jax.block_until_ready(out)

    ref = reference_forward(x, params)
    assert out.shape == (batch, n_actions)
    assert jnp.allclose(out, ref, atol=1e-5, rtol=1e-5), "mismatch vs reference"

    # tiny / non-tile-multiple batch (action-selection path: pads to 8 rows only)
    x_small = x[:3]
    out_small = jax.block_until_ready(dqn_forward(x_small, params))
    assert out_small.shape == (3, n_actions)
    assert jnp.allclose(out_small, ref[:3], atol=1e-5, rtol=1e-5), "mismatch (small batch)"

    # multi-tile batch (exercises the pipelined grid path)
    x_big = jnp.concatenate([x, x, x, x, x], axis=0)          # B = 1280 -> 3 tiles of 512
    out_big = jax.block_until_ready(dqn_forward(x_big, params))
    ref_big = jnp.concatenate([ref, ref, ref, ref, ref], axis=0)
    assert jnp.allclose(out_big, ref_big, atol=1e-5, rtol=1e-5), "mismatch (big batch)"

    print("KERNEL_OK")
</pallas_src>

<mosaic_0001>
module attributes {stable_mosaic.version = 11 : i64} {
  func.func @dqn_kernel(%arg0: i32, %arg1: memref<256x4xf32, #tpu.memory_space<vmem>>, %arg2: memref<4x128xf32, #tpu.memory_space<vmem>>, %arg3: memref<1x128xf32, #tpu.memory_space<vmem>>, %arg4: memref<128x128xf32, #tpu.memory_space<vmem>>, %arg5: memref<1x128xf32, #tpu.memory_space<vmem>>, %arg6: memref<128x128xf32, #tpu.memory_space<vmem>>, %arg7: memref<1x128xf32, #tpu.memory_space<vmem>>, %arg8: memref<256x128xf32, #tpu.memory_space<vmem>>) attributes {dimension_semantics = [#tpu.dimension_semantics<parallel>], iteration_bounds = array<i64: 1>, scalar_prefetch = 0 : i64, scratch_operands = 0 : i64, tpu.core_type = #tpu.core_type<tc>, window_params = [{transform_indices = @transform_0, window_bounds = array<i64: 256, 4>}, {pipeline_mode = #tpu.pipeline_mode<synchronous>, transform_indices = @transform_1, window_bounds = array<i64: 4, 128>}, {pipeline_mode = #tpu.pipeline_mode<synchronous>, transform_indices = @transform_2, window_bounds = array<i64: 1, 128>}, {pipeline_mode = #tpu.pipeline_mode<synchronous>, transform_indices = @transform_3, window_bounds = array<i64: 128, 128>}, {pipeline_mode = #tpu.pipeline_mode<synchronous>, transform_indices = @transform_4, window_bounds = array<i64: 1, 128>}, {pipeline_mode = #tpu.pipeline_mode<synchronous>, transform_indices = @transform_5, window_bounds = array<i64: 128, 128>}, {pipeline_mode = #tpu.pipeline_mode<synchronous>, transform_indices = @transform_6, window_bounds = array<i64: 1, 128>}, {transform_indices = @transform_7, window_bounds = array<i64: 256, 128>}]} {
    %c0 = arith.constant 0 : index
    %c0_0 = arith.constant 0 : index
    %0 = vector.load %arg1[%c0, %c0_0] : memref<256x4xf32, #tpu.memory_space<vmem>>, vector<256x4xf32>
    %c0_1 = arith.constant 0 : index
    %c0_2 = arith.constant 0 : index
    %1 = vector.load %arg2[%c0_1, %c0_2] : memref<4x128xf32, #tpu.memory_space<vmem>>, vector<4x128xf32>
    %cst = arith.constant dense<0.000000e+00> : vector<256x128xf32>
    %2 = tpu.matmul %0, %1, %cst {dimension_numbers = #tpu.dot_dimension_numbers<[1], [0], [0], [1], [0, 0, 1, 1], [], []>} : vector<256x4xf32>, vector<4x128xf32>, vector<256x128xf32> -> vector<256x128xf32>
    %c0_3 = arith.constant 0 : index
    %c0_4 = arith.constant 0 : index
    %3 = vector.load %arg3[%c0_3, %c0_4] : memref<1x128xf32, #tpu.memory_space<vmem>>, vector<1x128xf32>
    %4 = vector.broadcast %3 : vector<1x128xf32> to vector<256x128xf32>
    %5 = arith.addf %2, %4 : vector<256x128xf32>
    %cst_5 = arith.constant 0.000000e+00 : f32
    %6 = vector.broadcast %cst_5 : f32 to vector<256x128xf32>
    %7 = arith.maximumf %5, %6 : vector<256x128xf32>
    %c0_6 = arith.constant 0 : index
    %c0_7 = arith.constant 0 : index
    %8 = vector.load %arg4[%c0_6, %c0_7] : memref<128x128xf32, #tpu.memory_space<vmem>>, vector<128x128xf32>
    %cst_8 = arith.constant dense<0.000000e+00> : vector<256x128xf32>
    %9 = tpu.matmul %7, %8, %cst_8 {dimension_numbers = #tpu.dot_dimension_numbers<[1], [0], [0], [1], [0, 0, 1, 1], [], []>} : vector<256x128xf32>, vector<128x128xf32>, vector<256x128xf32> -> vector<256x128xf32>
    %c0_9 = arith.constant 0 : index
    %c0_10 = arith.constant 0 : index
    %10 = vector.load %arg5[%c0_9, %c0_10] : memref<1x128xf32, #tpu.memory_space<vmem>>, vector<1x128xf32>
    %11 = vector.broadcast %10 : vector<1x128xf32> to vector<256x128xf32>
    %12 = arith.addf %9, %11 : vector<256x128xf32>
    %cst_11 = arith.constant 0.000000e+00 : f32
    %13 = vector.broadcast %cst_11 : f32 to vector<256x128xf32>
    %14 = arith.maximumf %12, %13 : vector<256x128xf32>
    %c0_12 = arith.constant 0 : index
    %c0_13 = arith.constant 0 : index
    %15 = vector.load %arg6[%c0_12, %c0_13] : memref<128x128xf32, #tpu.memory_space<vmem>>, vector<128x128xf32>
    %cst_14 = arith.constant dense<0.000000e+00> : vector<256x128xf32>
    %16 = tpu.matmul %14, %15, %cst_14 {dimension_numbers = #tpu.dot_dimension_numbers<[1], [0], [0], [1], [0, 0, 1, 1], [], []>} : vector<256x128xf32>, vector<128x128xf32>, vector<256x128xf32> -> vector<256x128xf32>
    %c0_15 = arith.constant 0 : index
    %c0_16 = arith.constant 0 : index
    %17 = vector.load %arg7[%c0_15, %c0_16] : memref<1x128xf32, #tpu.memory_space<vmem>>, vector<1x128xf32>
    %18 = vector.broadcast %17 : vector<1x128xf32> to vector<256x128xf32>
    %19 = arith.addf %16, %18 : vector<256x128xf32>
    %c0_17 = arith.constant 0 : index
    %c0_18 = arith.constant 0 : index
    %20 = vector.load %arg8[%c0_17, %c0_18] : memref<256x128xf32, #tpu.memory_space<vmem>>, vector<256x128xf32>
    tpu.vector_store %arg8[%c0_17, %c0_18], %19 {strides = array<i32>} : memref<256x128xf32, #tpu.memory_space<vmem>>, vector<256x128xf32>,
    return
  }
  func.func @transform_0(%arg0: i32) -> (i32, i32) {
    %c0_i32 = arith.constant 0 : i32
    %c0_i32_0 = arith.constant 0 : i32
    return %arg0, %c0_i32 : i32, i32
  }
  func.func @transform_1(%arg0: i32) -> (i32, i32) {
    %c0_i32 = arith.constant 0 : i32
    %c0_i32_0 = arith.constant 0 : i32
    %c0_i32_1 = arith.constant 0 : i32
    return %c0_i32, %c0_i32_0 : i32, i32
  }
  func.func @transform_2(%arg0: i32) -> (i32, i32) {
    %c0_i32 = arith.constant 0 : i32
    %c0_i32_0 = arith.constant 0 : i32
    %c0_i32_1 = arith.constant 0 : i32
    return %c0_i32, %c0_i32_0 : i32, i32
  }
  func.func @transform_3(%arg0: i32) -> (i32, i32) {
    %c0_i32 = arith.constant 0 : i32
    %c0_i32_0 = arith.constant 0 : i32
    %c0_i32_1 = arith.constant 0 : i32
    return %c0_i32, %c0_i32_0 : i32, i32
  }
  func.func @transform_4(%arg0: i32) -> (i32, i32) {
    %c0_i32 = arith.constant 0 : i32
    %c0_i32_0 = arith.constant 0 : i32
    %c0_i32_1 = arith.constant 0 : i32
    return %c0_i32, %c0_i32_0 : i32, i32
  }
  func.func @transform_5(%arg0: i32) -> (i32, i32) {
    %c0_i32 = arith.constant 0 : i32
    %c0_i32_0 = arith.constant 0 : i32
    %c0_i32_1 = arith.constant 0 : i32
    return %c0_i32, %c0_i32_0 : i32, i32
  }
  func.func @transform_6(%arg0: i32) -> (i32, i32) {
    %c0_i32 = arith.constant 0 : i32
    %c0_i32_0 = arith.constant 0 : i32
    %c0_i32_1 = arith.constant 0 : i32
    return %c0_i32, %c0_i32_0 : i32, i32
  }
  func.func @transform_7(%arg0: i32) -> (i32, i32) {
    %c0_i32 = arith.constant 0 : i32
    %c0_i32_0 = arith.constant 0 : i32
    return %arg0, %c0_i32 : i32, i32
  }
}

</mosaic_0001>

<bundles_post_ra>
// kernel: tpu_custom_call.1
= control target key start
LH: loop header
LB: loop body
LE: loop exit
PB: predicated region body
PF: predicated region fallthrough
CT: control target
= control target key end

     0   :  { %vm161_vm0 = vcmask 1043456   ;;  %vm64_vm1 = vcmask 31744   ;;  %s1140_s0 = inlined_call_operand.vmem [shape: f32[256,4], index: 0, kind: input, shape index: {}]   ;;  %s1141_s1 = inlined_call_operand.vmem [shape: f32[4,128], index: 1, kind: input, shape index: {}]   ;;  %s1142_s2 = inlined_call_operand.vmem [shape: f32[1,128], index: 2, kind: input, shape index: {}]   ;;  %s1143_s3 = inlined_call_operand.vmem [shape: f32[128,128], index: 3, kind: input, shape index: {}]   ;;  %s1144_s4 = inlined_call_operand.vmem [shape: f32[1,128], index: 4, kind: input, shape index: {}]   ;;  %s1145_s5 = inlined_call_operand.vmem [shape: f32[128,128], index: 5, kind: input, shape index: {}]   ;;  %s1146_s6 = inlined_call_operand.vmem [shape: f32[1,128], index: 6, kind: input, shape index: {}]   ;;  %s1147_s7 = inlined_call_operand.hbm [shape: f32[256,128], index: 7, kind: output, shape index: {}]  }
   0x1   :  { %v59_v0 = vld [vmem:[%s1141_s1] sm:$0xf] }
   0x2   :  { %v27_v1 = vld [vmem:[%s1140_s0] sm:$0xff]  ;;  %658 = vmatpush.msk.msra.mxu0 %vm161_vm0, %v59_v0  ;;  %691 = vmatpush.msk.msra.mxu3 %vm161_vm0, %v59_v0 }
   0x3   :  { %659 = vmatmul.msk.f32.vlgmr.msra.gmra.mxu0 %vm64_vm1, %v27_v1 }
   0x4   :  { %12 = vsyncpa [#allocation3], 0  ;;  %v28_v2 = vld [vmem:[%s1140_s0 + $0x8] sm:$0xff]  ;;  %v29_v3 = vld [vmem:[%s1140_s0 + $0x10] sm:$0xff]  ;;  %s646_s10 = sshll.u32 %s1147_s7, 4  ;;  %s757_s11 = smov 128   ;;  %s647_s10 = int_to_ptr.hbm [resolvable:$true] %s646_s10 }
   0x5   :  { %v30_v4 = vld [vmem:[%s1140_s0 + $0x18] sm:$0xff]  ;;  %v31_v5 = vld [vmem:[%s1140_s0 + $0x20] sm:$0xff]  ;;  %v32_v6 = vld [vmem:[%s1140_s0 + $0x28] sm:$0xff]  ;;  %s758_s12 = smov 8  }
   0x6   :  { %v33_v7 = vld [vmem:[%s1140_s0 + $0x30] sm:$0xff]  ;;  %v34_v8 = vld [vmem:[%s1140_s0 + $0x38] sm:$0xff]  ;;  %v35_v9 = vld [vmem:[%s1140_s0 + $0x40] sm:$0xff] }
   0x7   :  { %v325_v10 = vld [vmem:[%s1143_s3 + $0x78] sm:$0xff]  ;;  %v324_v11 = vld [vmem:[%s1143_s3 + $0x70] sm:$0xff]  ;;  %v323_v12 = vld [vmem:[%s1143_s3 + $0x68] sm:$0xff] }
   0x8   :  { %330 = vmatpush.msra.mxu1 %v325_v10  ;;  %692 = vmatpush.msrb.mxu3 %v325_v10  ;;  %v36_v13 = vld [vmem:[%s1140_s0 + $0x48] sm:$0xff]  ;;  %v322_v14 = vld [vmem:[%s1143_s3 + $0x60] sm:$0xff]  ;;  %v321_v15 = vld [vmem:[%s1143_s3 + $0x58] sm:$0xff] }
   0x9   :  { %v320_v16 = vld [vmem:[%s1143_s3 + $0x50] sm:$0xff]  ;;  %v319_v17 = vld [vmem:[%s1143_s3 + $0x48] sm:$0xff]  ;;  %v318_v19 = vld [vmem:[%s1143_s3 + $0x40] sm:$0xff] }
   0xa   :  { %331 = vmatpush.msra.mxu1 %v324_v11  ;;  %693 = vmatpush.msrb.mxu3 %v324_v11  ;;  %v37_v18 = vld [vmem:[%s1140_s0 + $0x50] sm:$0xff]  ;;  %v317_v20 = vld [vmem:[%s1143_s3 + $0x38] sm:$0xff]  ;;  %v315_v22 = vld [vmem:[%s1143_s3 + $0x28] sm:$0xff] }
   0xb   :  { %660 = vmatmul.msk.f32.gmra.mxu0 %vm64_vm1, %v28_v2  ;;  %v316_v21 = vld [vmem:[%s1143_s3 + $0x30] sm:$0xff]  ;;  %v38_v23 = vld [vmem:[%s1140_s0 + $0x58] sm:$0xff]  ;;  %v314_v24 = vld [vmem:[%s1143_s3 + $0x20] sm:$0xff] }
   0xc   :  { %332 = vmatpush.msra.mxu1 %v323_v12  ;;  %694 = vmatpush.msrb.mxu3 %v323_v12  ;;  %v313_v25 = vld [vmem:[%s1143_s3 + $0x18] sm:$0xff]  ;;  %v312_v26 = vld [vmem:[%s1143_s3 + $0x10] sm:$0xff]  ;;  %v39_v27 = vld [vmem:[%s1140_s0 + $0x60] sm:$0xff] }
   0xd   :  { %v311_v28 = vld [vmem:[%s1143_s3 + $0x8] sm:$0xff]  ;;  %v310_v29 = vld [vmem:[%s1143_s3] sm:$0xff]  ;;  %v41_v31 = vld [vmem:[%s1140_s0 + $0x70] sm:$0xff] }
   0xe   :  { %333 = vmatpush.msra.mxu1 %v322_v14  ;;  %695 = vmatpush.msrb.mxu3 %v322_v14  ;;  %v40_v30 = vld [vmem:[%s1140_s0 + $0x68] sm:$0xff]  ;;  %v42_v32 = vld [vmem:[%s1140_s0 + $0x78] sm:$0xff]  ;;  %v917_v33 = vld [vmem:[%s1142_s2] ss:$0 sm:$0xff] }
   0xf   :  { %v43_v35 = vld [vmem:[%s1140_s0 + $0x80] sm:$0xff]  ;;  %v44_v39 = vld [vmem:[%s1140_s0 + $0x88] sm:$0xff]  ;;  %v45_v43 = vld [vmem:[%s1140_s0 + $0x90] sm:$0xff] }
  0x10   :  { %334 = vmatpush.msra.mxu1 %v321_v15  ;;  %696 = vmatpush.msrb.mxu3 %v321_v15  ;;  %v46_v47 = vld [vmem:[%s1140_s0 + $0x98] sm:$0xff]  ;;  %v47_v51 = vld [vmem:[%s1140_s0 + $0xa0] sm:$0xff]  ;;  %v48_v55 = vld [vmem:[%s1140_s0 + $0xa8] sm:$0xff] }
  0x11   :  { %v53_v58 = vld [vmem:[%s1140_s0 + $0xd0] sm:$0xff]  ;;  %v54_v63 = vld [vmem:[%s1140_s0 + $0xd8] sm:$0xff]  ;;  %v52_v12 = vld [vmem:[%s1140_s0 + $0xc8] sm:$0xff] }
  0x12   :  { %335 = vmatpush.msra.mxu1 %v320_v16  ;;  %697 = vmatpush.msrb.mxu3 %v320_v16  ;;  %v49_v60 = vld [vmem:[%s1140_s0 + $0xb0] sm:$0xff]  ;;  %v50_v1 = vld [vmem:[%s1140_s0 + $0xb8] sm:$0xff]  ;;  %v488_v16 = vld [vmem:[%s1145_s5 + $0x68] sm:$0xff] }
  0x13   :  { %661 = vmatmul.msk.f32.gmra.mxu0 %vm64_vm1, %v29_v3  ;;  %685 = vmatmul.msk.f32.vlgmr.msra.gmra.mxu3 %vm64_vm1, %v53_v58  ;;  %v490_v10 = vld [vmem:[%s1145_s5 + $0x78] sm:$0xff]  ;;  %v489_v14 = vld [vmem:[%s1145_s5 + $0x70] sm:$0xff] }
  0x14   :  { %336 = vmatpush.msra.mxu1 %v319_v17  ;;  %698 = vmatpush.msrb.mxu3 %v319_v17  ;;  %v57_v17 = vld [vmem:[%s1140_s0 + $0xf0] sm:$0xff] }
  0x15   :  { %495 = vmatpush.msra.mxu2 %v490_v10 }
  0x16   :  { %337 = vmatpush.msra.mxu1 %v318_v19  ;;  %699 = vmatpush.msrb.mxu3 %v318_v19  ;;  %v486_v19 = vld [vmem:[%s1145_s5 + $0x58] sm:$0xff] }
  0x17   :  { %496 = vmatpush.msra.mxu2 %v489_v14 }
  0x18   :  { %338 = vmatpush.msra.mxu1 %v317_v20  ;;  %700 = vmatpush.msrb.mxu3 %v317_v20 }
  0x19   :  { %497 = vmatpush.msra.mxu2 %v488_v16 }
  0x1a   :  { %339 = vmatpush.msra.mxu1 %v316_v21  ;;  %701 = vmatpush.msrb.mxu3 %v316_v21 }
  0x1b   :  { %662 = vmatmul.msk.f32.gmra.mxu0 %vm64_vm1, %v30_v4  ;;  %686 = vmatmul.msk.f32.gmra.mxu3 %vm64_vm1, %v54_v63  ;;  %v55_v4 = vld [vmem:[%s1140_s0 + $0xe0] sm:$0xff] }
  0x1c   :  { %340 = vmatpush.msra.mxu1 %v315_v22  ;;  %702 = vmatpush.msrb.mxu3 %v315_v22  ;;  %v485_v22 = vld [vmem:[%s1145_s5 + $0x50] sm:$0xff] }
  0x1e   :  { %341 = vmatpush.msra.mxu1 %v314_v24  ;;  %703 = vmatpush.msrb.mxu3 %v314_v24  ;;  %v484_v24 = vld [vmem:[%s1145_s5 + $0x48] sm:$0xff] }
  0x20   :  { %342 = vmatpush.msra.mxu1 %v313_v25  ;;  %704 = vmatpush.msrb.mxu3 %v313_v25  ;;  %v58_v25 = vld [vmem:[%s1140_s0 + $0xf8] sm:$0xff] }
  0x22   :  { %343 = vmatpush.msra.mxu1 %v312_v26  ;;  %705 = vmatpush.msrb.mxu3 %v312_v26  ;;  %v483_v26 = vld [vmem:[%s1145_s5 + $0x40] sm:$0xff] }
  0x23   :  { %663 = vmatmul.msk.f32.gmra.mxu0 %vm64_vm1, %v31_v5  ;;  %687 = vmatmul.msk.f32.gmra.mxu3 %vm64_vm1, %v55_v4 }
  0x24   :  { %344 = vmatpush.msra.mxu1 %v311_v28  ;;  %706 = vmatpush.msrb.mxu3 %v311_v28 }
  0x26   :  { %345 = vmatpush.msra.mxu1 %v310_v29  ;;  %707 = vmatpush.msrb.mxu3 %v310_v29 }
  0x28   :  { %708 = vmatpush.msra.mxu3 %v490_v10 }
  0x2a   :  { %709 = vmatpush.msra.mxu3 %v489_v14 }
  0x2b   :  { %664 = vmatmul.msk.f32.gmra.mxu0 %vm64_vm1, %v32_v6  ;;  %v51_v6 = vld [vmem:[%s1140_s0 + $0xc0] sm:$0xff] }
  0x2c   :  { %710 = vmatpush.msra.mxu3 %v488_v16 }
  0x33   :  { %665 = vmatmul.msk.f32.gmra.mxu0 %vm64_vm1, %v33_v7 }
  0x3b   :  { %666 = vmatmul.msk.f32.gmra.mxu0 %vm64_vm1, %v34_v8 }
  0x43   :  { %667 = vmatmul.msk.f32.gmra.mxu0 %vm64_vm1, %v35_v9  ;;  %v56_v9 = vld [vmem:[%s1140_s0 + $0xe8] sm:$0xff] }
  0x44   :  { %688 = vmatmul.msk.f32.gmra.mxu3 %vm64_vm1, %v56_v9 }
  0x4b   :  { %668 = vmatmul.msk.f32.gmra.mxu0 %vm64_vm1, %v36_v13 }
  0x4c   :  { %689 = vmatmul.msk.f32.gmra.mxu3 %vm64_vm1, %v57_v17 }
  0x53   :  { %669 = vmatmul.msk.f32.gmra.mxu0 %vm64_vm1, %v37_v18  ;;  %v487_v18 = vld [vmem:[%s1145_s5 + $0x60] sm:$0xff] }
  0x54   :  { %498 = vmatpush.msra.mxu2 %v487_v18  ;;  %711 = vmatpush.msra.mxu3 %v487_v18 }
  0x55   :  { %690 = vmatmul.msk.f32.gmra.mxu3 %vm64_vm1, %v58_v25 }
  0x56   :  { %499 = vmatpush.msra.mxu2 %v486_v19  ;;  %712 = vmatpush.msra.mxu3 %v486_v19 }
  0x58   :  { %500 = vmatpush.msra.mxu2 %v485_v22  ;;  %713 = vmatpush.msra.mxu3 %v485_v22 }
  0x5a   :  { %501 = vmatpush.msra.mxu2 %v484_v24  ;;  %714 = vmatpush.msra.mxu3 %v484_v24 }
  0x5b   :  { %670 = vmatmul.msk.f32.gmra.mxu0 %vm64_vm1, %v38_v23 }
  0x5c   :  { %502 = vmatpush.msra.mxu2 %v483_v26  ;;  %715 = vmatpush.msra.mxu3 %v483_v26 }
  0x63   :  { %671 = vmatmul.msk.f32.gmra.mxu0 %vm64_vm1, %v39_v27  ;;  %v482_v27 = vld [vmem:[%s1145_s5 + $0x38] sm:$0xff] }
  0x64   :  { %503 = vmatpush.msra.mxu2 %v482_v27  ;;  %716 = vmatpush.msra.mxu3 %v482_v27 }
  0x6b   :  { %672 = vmatmul.msk.f32.gmra.mxu0 %vm64_vm1, %v40_v30  ;;  %v481_v30 = vld [vmem:[%s1145_s5 + $0x30] sm:$0xff] }
  0x6c   :  { %504 = vmatpush.msra.mxu2 %v481_v30  ;;  %717 = vmatpush.msra.mxu3 %v481_v30 }
  0x73   :  { %673 = vmatmul.msk.f32.gmra.mxu0 %vm64_vm1, %v41_v31 }
  0x7b   :  { %674 = vmatmul.msk.f32.gmra.mxu0 %vm64_vm1, %v42_v32  ;;  %v480_v32 = vld [vmem:[%s1145_s5 + $0x28] sm:$0xff] }
  0x7c   :  { %505 = vmatpush.msra.mxu2 %v480_v32  ;;  %718 = vmatpush.msra.mxu3 %v480_v32 }
  0x80   :  { %v182_v34 = vpop.f32.mrf.mxu0 }
  0x81   :  { %v183_v36 = vadd.f32 %v917_v33, %v182_v34  ;;  %v479_v34 = vld [vmem:[%s1145_s5 + $0x20] sm:$0xff] }
  0x82   :  { %506 = vmatpush.msra.mxu2 %v479_v34  ;;  %719 = vmatpush.msra.mxu3 %v479_v34 }
  0x83   :  { %675 = vmatmul.msk.f32.gmra.mxu0 %vm64_vm1, %v43_v35  ;;  %v278_v37 = vmax.f32 %v183_v36, 0.0  ;;  %v478_v35 = vld [vmem:[%s1145_s5 + $0x18] sm:$0xff] }
  0x84   :  { %507 = vmatpush.msra.mxu2 %v478_v35  ;;  %720 = vmatpush.msra.mxu3 %v478_v35 }
  0x85   :  { %346 = vmatmul.f32.vlgmr.msra.gmra.mxu1 %v278_v37 }
  0x88   :  { %v185_v38 = vpop.f32.mrf.mxu0 }
  0x89   :  { %v186_v40 = vadd.f32 %v917_v33, %v185_v38  ;;  %v477_v38 = vld [vmem:[%s1145_s5 + $0x10] sm:$0xff] }
  0x8a   :  { %508 = vmatpush.msra.mxu2 %v477_v38  ;;  %721 = vmatpush.msra.mxu3 %v477_v38 }
  0x8b   :  { %676 = vmatmul.msk.f32.gmra.mxu0 %vm64_vm1, %v44_v39  ;;  %v279_v41 = vmax.f32 %v186_v40, 0.0  ;;  %v476_v40 = vld [vmem:[%s1145_s5 + $0x8] sm:$0xff] }
  0x8c   :  { %509 = vmatpush.msra.mxu2 %v476_v40  ;;  %722 = vmatpush.msra.mxu3 %v476_v40 }
  0x8d   :  { %349 = vmatmul.f32.gmra.mxu1 %v279_v41  ;;  %v475_v41 = vld [vmem:[%s1145_s5] sm:$0xff] }
  0x8e   :  { %510 = vmatpush.msra.mxu2 %v475_v41  ;;  %723 = vmatpush.msra.mxu3 %v475_v41 }
  0x90   :  { %v188_v42 = vpop.f32.mrf.mxu0 }
  0x91   :  { %v189_v44 = vadd.f32 %v917_v33, %v188_v42 }
  0x93   :  { %v280_v45 = vmax.f32 %v189_v44, 0.0  ;;  %677 = vmatmul.msk.f32.gmra.mxu0 %vm64_vm1, %v45_v43 }
  0x95   :  { %352 = vmatmul.f32.gmra.mxu1 %v280_v45 }
  0x96   :  { %v260_v38 = vpop.f32.mrf.mxu3 }
  0x98   :  { %v191_v46 = vpop.f32.mrf.mxu0 }
  0x99   :  { %v192_v48 = vadd.f32 %v917_v33, %v191_v46 }
  0x9b   :  { %v281_v49 = vmax.f32 %v192_v48, 0.0  ;;  %678 = vmatmul.msk.f32.gmra.mxu0 %vm64_vm1, %v46_v47 }
  0x9d   :  { %355 = vmatmul.f32.gmra.mxu1 %v281_v49 }
  0xa0   :  { %v194_v50 = vpop.f32.mrf.mxu0 }
  0xa1   :  { %v195_v52 = vadd.f32 %v917_v33, %v194_v50 }
  0xa3   :  { %v282_v53 = vmax.f32 %v195_v52, 0.0  ;;  %679 = vmatmul.msk.f32.gmra.mxu0 %vm64_vm1, %v47_v51  ;;  %v1050_v51 = vld [vmem:[%s1144_s4] ss:$0 sm:$0xff] }
  0xa5   :  { %358 = vmatmul.f32.gmra.mxu1 %v282_v53 }
  0xa8   :  { %v197_v54 = vpop.f32.mrf.mxu0 }
  0xa9   :  { %v198_v56 = vadd.f32 %v917_v33, %v197_v54 }
  0xab   :  { %v283_v57 = vmax.f32 %v198_v56, 0.0  ;;  %680 = vmatmul.msk.f32.gmra.mxu0 %vm64_vm1, %v48_v55 }
  0xad   :  { %361 = vmatmul.f32.gmra.mxu1 %v283_v57 }
  0xb0   :  { %v200_v59 = vpop.f32.mrf.mxu0 }
  0xb1   :  { %v201_v61 = vadd.f32 %v917_v33, %v200_v59 }
  0xb3   :  { %v284_v62 = vmax.f32 %v201_v61, 0.0  ;;  %681 = vmatmul.msk.f32.gmra.mxu0 %vm64_vm1, %v49_v60 }
  0xb5   :  { %364 = vmatmul.f32.gmra.mxu1 %v284_v62 }
  0xb8   :  { %v203_v0 = vpop.f32.mrf.mxu0 }
  0xb9   :  { %v204_v2 = vadd.f32 %v917_v33, %v203_v0 }
  0xbb   :  { %v285_v3 = vmax.f32 %v204_v2, 0.0  ;;  %682 = vmatmul.msk.f32.gmra.mxu0 %vm64_vm1, %v50_v1 }
  0xbd   :  { %367 = vmatmul.f32.gmra.mxu1 %v285_v3 }
  0xc0   :  { %v206_v5 = vpop.f32.mrf.mxu0 }
  0xc1   :  { %v207_v7 = vadd.f32 %v917_v33, %v206_v5 }
  0xc3   :  { %v286_v8 = vmax.f32 %v207_v7, 0.0  ;;  %683 = vmatmul.msk.f32.gmra.mxu0 %vm64_vm1, %v51_v6 }
  0xc5   :  { %370 = vmatmul.f32.gmra.mxu1 %v286_v8 }
  0xc8   :  { %v209_v11 = vpop.f32.mrf.mxu0 }
  0xc9   :  { %v210_v13 = vadd.f32 %v917_v33, %v209_v11 }
  0xcb   :  { %v287_v15 = vmax.f32 %v210_v13, 0.0  ;;  %684 = vmatmul.msk.f32.gmra.mxu0 %vm64_vm1, %v52_v12 }
  0xcd   :  { %373 = vmatmul.f32.gmra.mxu1 %v287_v15 }
  0xd0   :  { %v212_v20 = vpop.f32.mrf.mxu0 }
  0xd1   :  { %v213_v21 = vadd.f32 %v917_v33, %v212_v20 }
  0xd3   :  { %v288_v23 = vmax.f32 %v213_v21, 0.0 }
  0xd5   :  { %376 = vmatmul.f32.gmra.mxu1 %v288_v23 }
  0xd8   :  { %v215_v28 = vpop.f32.mrf.mxu0 }
  0xd9   :  { %v216_v29 = vadd.f32 %v917_v33, %v215_v28 }
  0xdb   :  { %v289_v31 = vmax.f32 %v216_v29, 0.0 }
  0xdd   :  { %379 = vmatmul.f32.gmra.mxu1 %v289_v31 }
  0xe0   :  { %v218_v36 = vpop.f32.mrf.mxu0 }
  0xe1   :  { %v219_v37 = vadd.f32 %v917_v33, %v218_v36 }
  0xe3   :  { %v290_v39 = vmax.f32 %v219_v37, 0.0 }
  0xe5   :  { %382 = vmatmul.f32.gmra.mxu1 %v290_v39 }
  0xe8   :  { %v221_v42 = vpop.f32.mrf.mxu0 }
  0xe9   :  { %v222_v43 = vadd.f32 %v917_v33, %v221_v42 }
  0xeb   :  { %v291_v44 = vmax.f32 %v222_v43, 0.0 }
  0xed   :  { %385 = vmatmul.f32.gmra.mxu1 %v291_v44 }
  0xf0   :  { %v224_v45 = vpop.f32.mrf.mxu0 }
  0xf1   :  { %v225_v46 = vadd.f32 %v917_v33, %v224_v45 }
  0xf3   :  { %v292_v47 = vmax.f32 %v225_v46, 0.0 }
  0xf5   :  { %388 = vmatmul.f32.gmra.mxu1 %v292_v47  ;;  %v263_v47 = vpop.f32.mrf.mxu3 }
  0xf8   :  { %v227_v48 = vpop.f32.mrf.mxu0 }
  0xf9   :  { %v228_v49 = vadd.f32 %v917_v33, %v227_v48 }
  0xfb   :  { %v293_v50 = vmax.f32 %v228_v49, 0.0 }
  0xfd   :  { %391 = vmatmul.f32.gmra.mxu1 %v293_v50 }
 0x100   :  { %v230_v52 = vpop.f32.mrf.mxu0 }
 0x101   :  { %v231_v53 = vadd.f32 %v917_v33, %v230_v52  ;;  %v261_v52 = vadd.f32 %v917_v33, %v260_v38 }
 0x102   :  { %v347_v54 = vpop.f32.mrf.mxu1 }
 0x103   :  { %v294_v55 = vmax.f32 %v231_v53, 0.0  ;;  %v348_v56 = vadd.f32 %v1050_v51, %v347_v54  ;;  %v304_v53 = vmax.f32 %v261_v52, 0.0 }
 0x105   :  { %v443_v57 = vmax.f32 %v348_v56, 0.0  ;;  %394 = vmatmul.f32.gmra.mxu1 %v294_v55  ;;  %v266_v56 = vpop.f32.mrf.mxu3 }
 0x107   :  { %511 = vmatmul.f32.vlgmr.msra.gmra.mxu2 %v443_v57 }
 0x108   :  { %v233_v58 = vpop.f32.mrf.mxu0 }
 0x109   :  { %v234_v59 = vadd.f32 %v917_v33, %v233_v58  ;;  %v264_v58 = vadd.f32 %v917_v33, %v263_v47 }
 0x10a   :  { %v350_v60 = vpop.f32.mrf.mxu1 }
 0x10b   :  { %v295_v61 = vmax.f32 %v234_v59, 0.0  ;;  %v351_v62 = vadd.f32 %v1050_v51, %v350_v60  ;;  %v305_v59 = vmax.f32 %v264_v58, 0.0 }
 0x10d   :  { %v444_v63 = vmax.f32 %v351_v62, 0.0  ;;  %397 = vmatmul.f32.gmra.mxu1 %v295_v61 }
 0x10f   :  { %514 = vmatmul.f32.gmra.mxu2 %v444_v63  ;;  %v267_v63 = vadd.f32 %v917_v33, %v266_v56 }
 0x110   :  { %v236_v0 = vpop.f32.mrf.mxu0 }
 0x111   :  { %v237_v1 = vadd.f32 %v917_v33, %v236_v0  ;;  %v269_v0 = vpop.f32.mrf.mxu3 }
 0x112   :  { %v353_v2 = vpop.f32.mrf.mxu1 }
 0x113   :  { %v296_v3 = vmax.f32 %v237_v1, 0.0  ;;  %v354_v4 = vadd.f32 %v1050_v51, %v353_v2  ;;  %v306_v1 = vmax.f32 %v267_v63, 0.0 }
 0x115   :  { %v445_v5 = vmax.f32 %v354_v4, 0.0  ;;  %400 = vmatmul.f32.gmra.mxu1 %v296_v3 }
 0x117   :  { %517 = vmatmul.f32.gmra.mxu2 %v445_v5  ;;  %v270_v5 = vadd.f32 %v917_v33, %v269_v0 }
 0x118   :  { %v239_v6 = vpop.f32.mrf.mxu0 }
 0x119   :  { %v240_v7 = vadd.f32 %v917_v33, %v239_v6  ;;  %v272_v6 = vpop.f32.mrf.mxu3 }
 0x11a   :  { %v356_v8 = vpop.f32.mrf.mxu1 }
 0x11b   :  { %v297_v9 = vmax.f32 %v240_v7, 0.0  ;;  %v357_v10 = vadd.f32 %v1050_v51, %v356_v8  ;;  %v307_v7 = vmax.f32 %v270_v5, 0.0 }
 0x11d   :  { %v446_v11 = vmax.f32 %v357_v10, 0.0  ;;  %403 = vmatmul.f32.gmra.mxu1 %v297_v9 }
 0x11f   :  { %520 = vmatmul.f32.gmra.mxu2 %v446_v11  ;;  %v273_v11 = vadd.f32 %v917_v33, %v272_v6 }
 0x120   :  { %v242_v12 = vpop.f32.mrf.mxu0 }
 0x121   :  { %v243_v13 = vadd.f32 %v917_v33, %v242_v12  ;;  %v308_v12 = vmax.f32 %v273_v11, 0.0 }
 0x122   :  { %v359_v14 = vpop.f32.mrf.mxu1 }
 0x123   :  { %v298_v15 = vmax.f32 %v243_v13, 0.0  ;;  %v360_v16 = vadd.f32 %v1050_v51, %v359_v14  ;;  %v275_v14 = vpop.f32.mrf.mxu3 }
 0x125   :  { %v447_v17 = vmax.f32 %v360_v16, 0.0  ;;  %406 = vmatmul.f32.gmra.mxu1 %v298_v15 }
 0x127   :  { %523 = vmatmul.f32.gmra.mxu2 %v447_v17  ;;  %v276_v17 = vadd.f32 %v917_v33, %v275_v14 }
 0x128   :  { %v245_v18 = vpop.f32.mrf.mxu0 }
 0x129   :  { %v246_v19 = vadd.f32 %v917_v33, %v245_v18  ;;  %v309_v18 = vmax.f32 %v276_v17, 0.0 }
 0x12a   :  { %v362_v20 = vpop.f32.mrf.mxu1 }
 0x12b   :  { %v299_v21 = vmax.f32 %v246_v19, 0.0  ;;  %v363_v22 = vadd.f32 %v1050_v51, %v362_v20 }
 0x12d   :  { %v448_v23 = vmax.f32 %v363_v22, 0.0  ;;  %409 = vmatmul.f32.gmra.mxu1 %v299_v21 }
 0x12f   :  { %526 = vmatmul.f32.gmra.mxu2 %v448_v23 }
 0x130   :  { %v248_v24 = vpop.f32.mrf.mxu0 }
 0x131   :  { %v249_v25 = vadd.f32 %v917_v33, %v248_v24 }
 0x132   :  { %v365_v26 = vpop.f32.mrf.mxu1 }
 0x133   :  { %v300_v27 = vmax.f32 %v249_v25, 0.0  ;;  %v366_v28 = vadd.f32 %v1050_v51, %v365_v26  ;;  %v1088_v25 = vld [vmem:[%s1146_s6] ss:$0 sm:$0xff]  ;;  %s756_s6 = smov [#allocation2]  }
 0x134   :  { %s644_s8 = sshll.u32 %s756_s6, 4  ;;  %s645_s8 = int_to_ptr.vmem [resolvable:$true] %s644_s8 }
 0x135   :  { %v449_v29 = vmax.f32 %v366_v28, 0.0  ;;  %412 = vmatmul.f32.gmra.mxu1 %v300_v27 }
 0x137   :  { %529 = vmatmul.f32.gmra.mxu2 %v449_v29 }
 0x138   :  { %v251_v30 = vpop.f32.mrf.mxu0 }
 0x139   :  { %v252_v31 = vadd.f32 %v917_v33, %v251_v30 }
 0x13a   :  { %v368_v32 = vpop.f32.mrf.mxu1 }
 0x13b   :  { %v301_v34 = vmax.f32 %v252_v31, 0.0  ;;  %v369_v35 = vadd.f32 %v1050_v51, %v368_v32 }
 0x13d   :  { %v450_v36 = vmax.f32 %v369_v35, 0.0  ;;  %415 = vmatmul.f32.vlgmr.msrb.gmra.mxu3 %v301_v34 }
 0x13f   :  { %532 = vmatmul.f32.gmra.mxu2 %v450_v36 }
 0x140   :  { %v254_v37 = vpop.f32.mrf.mxu0 }
 0x141   :  { %v255_v39 = vadd.f32 %v917_v33, %v254_v37 }
 0x142   :  { %v371_v40 = vpop.f32.mrf.mxu1 }
 0x143   :  { %v302_v41 = vmax.f32 %v255_v39, 0.0  ;;  %v372_v42 = vadd.f32 %v1050_v51, %v371_v40 }
 0x145   :  { %v451_v43 = vmax.f32 %v372_v42, 0.0  ;;  %418 = vmatmul.f32.gmra.mxu3 %v302_v41 }
 0x147   :  { %535 = vmatmul.f32.gmra.mxu2 %v451_v43 }
 0x148   :  { %v257_v44 = vpop.f32.mrf.mxu0 }
 0x149   :  { %v258_v45 = vadd.f32 %v917_v33, %v257_v44 }
 0x14a   :  { %v374_v46 = vpop.f32.mrf.mxu1 }
 0x14b   :  { %v303_v48 = vmax.f32 %v258_v45, 0.0  ;;  %v375_v49 = vadd.f32 %v1050_v51, %v374_v46 }
 0x14d   :  { %v452_v50 = vmax.f32 %v375_v49, 0.0  ;;  %421 = vmatmul.f32.gmra.mxu3 %v303_v48 }
 0x14f   :  { %538 = vmatmul.f32.gmra.mxu2 %v452_v50 }
 0x152   :  { %v377_v54 = vpop.f32.mrf.mxu1 }
 0x153   :  { %v378_v55 = vadd.f32 %v1050_v51, %v377_v54 }
 0x155   :  { %v453_v57 = vmax.f32 %v378_v55, 0.0  ;;  %424 = vmatmul.f32.gmra.mxu3 %v304_v53 }
 0x157   :  { %541 = vmatmul.f32.gmra.mxu2 %v453_v57 }
 0x15a   :  { %v380_v60 = vpop.f32.mrf.mxu1 }
 0x15b   :  { %v381_v61 = vadd.f32 %v1050_v51, %v380_v60 }
 0x15d   :  { %v454_v62 = vmax.f32 %v381_v61, 0.0  ;;  %427 = vmatmul.f32.gmra.mxu3 %v305_v59 }
 0x15f   :  { %544 = vmatmul.f32.gmra.mxu2 %v454_v62 }
 0x162   :  { %v383_v2 = vpop.f32.mrf.mxu1 }
 0x163   :  { %v384_v3 = vadd.f32 %v1050_v51, %v383_v2 }
 0x165   :  { %v455_v4 = vmax.f32 %v384_v3, 0.0  ;;  %430 = vmatmul.f32.gmra.mxu3 %v306_v1 }
 0x167   :  { %547 = vmatmul.f32.gmra.mxu2 %v455_v4 }
 0x16a   :  { %v386_v8 = vpop.f32.mrf.mxu1 }
 0x16b   :  { %v387_v9 = vadd.f32 %v1050_v51, %v386_v8 }
 0x16d   :  { %v456_v10 = vmax.f32 %v387_v9, 0.0  ;;  %433 = vmatmul.f32.gmra.mxu3 %v307_v7 }
 0x16f   :  { %550 = vmatmul.f32.gmra.mxu2 %v456_v10 }
 0x172   :  { %v389_v13 = vpop.f32.mrf.mxu1 }
 0x173   :  { %v390_v15 = vadd.f32 %v1050_v51, %v389_v13 }
 0x175   :  { %v457_v16 = vmax.f32 %v390_v15, 0.0  ;;  %436 = vmatmul.f32.gmra.mxu3 %v308_v12 }
 0x177   :  { %553 = vmatmul.f32.gmra.mxu2 %v457_v16 }
 0x17a   :  { %v392_v19 = vpop.f32.mrf.mxu1 }
 0x17b   :  { %v393_v20 = vadd.f32 %v1050_v51, %v392_v19 }
 0x17d   :  { %v458_v21 = vmax.f32 %v393_v20, 0.0  ;;  %439 = vmatmul.f32.gmra.mxu3 %v309_v18 }
 0x17f   :  { %556 = vmatmul.f32.gmra.mxu2 %v458_v21 }
 0x182   :  { %v395_v22 = vpop.f32.mrf.mxu1 }
 0x183   :  { %v396_v23 = vadd.f32 %v1050_v51, %v395_v22 }
 0x185   :  { %v459_v24 = vmax.f32 %v396_v23, 0.0 }
 0x187   :  { %559 = vmatmul.f32.gmra.mxu2 %v459_v24 }
 0x18a   :  { %v398_v26 = vpop.f32.mrf.mxu1  ;;  %v512_v33 = vpop.f32.mrf.mxu2 }
 0x18b   :  { %v399_v27 = vadd.f32 %v1050_v51, %v398_v26  ;;  %v513_v28 = vadd.f32 %v1088_v25, %v512_v33 }
 0x18d   :  { %v460_v29 = vmax.f32 %v399_v27, 0.0  ;;  %608 = vst [vmem:[#allocation2] sm:$0xff] %v513_v28 }
 0x18f   :  { %562 = vmatmul.f32.gmra.mxu2 %v460_v29 }
 0x192   :  { %v401_v30 = vpop.f32.mrf.mxu1  ;;  %v515_v31 = vpop.f32.mrf.mxu2 }
 0x193   :  { %v402_v32 = vadd.f32 %v1050_v51, %v401_v30  ;;  %v516_v34 = vadd.f32 %v1088_v25, %v515_v31 }
 0x195   :  { %v461_v35 = vmax.f32 %v402_v32, 0.0  ;;  %609 = vst [vmem:[#allocation2 + $0x8] sm:$0xff] %v516_v34 }
 0x197   :  { %565 = vmatmul.f32.gmra.mxu2 %v461_v35 }
 0x19a   :  { %v404_v36 = vpop.f32.mrf.mxu1  ;;  %v518_v37 = vpop.f32.mrf.mxu2 }
 0x19b   :  { %v405_v38 = vadd.f32 %v1050_v51, %v404_v36  ;;  %v519_v39 = vadd.f32 %v1088_v25, %v518_v37 }
 0x19d   :  { %v462_v40 = vmax.f32 %v405_v38, 0.0  ;;  %610 = vst [vmem:[#allocation2 + $0x10] sm:$0xff] %v519_v39 }
 0x19f   :  { %568 = vmatmul.f32.gmra.mxu2 %v462_v40 }
 0x1a2   :  { %v407_v41 = vpop.f32.mrf.mxu1  ;;  %v521_v42 = vpop.f32.mrf.mxu2 }
 0x1a3   :  { %v408_v43 = vadd.f32 %v1050_v51, %v407_v41  ;;  %v522_v44 = vadd.f32 %v1088_v25, %v521_v42 }
 0x1a5   :  { %v463_v45 = vmax.f32 %v408_v43, 0.0  ;;  %611 = vst [vmem:[#allocation2 + $0x18] sm:$0xff] %v522_v44 }
 0x1a7   :  { %571 = vmatmul.f32.gmra.mxu2 %v463_v45 }
 0x1aa   :  { %v410_v46 = vpop.f32.mrf.mxu1  ;;  %v524_v47 = vpop.f32.mrf.mxu2 }
 0x1ab   :  { %v411_v48 = vadd.f32 %v1050_v51, %v410_v46  ;;  %v525_v49 = vadd.f32 %v1088_v25, %v524_v47 }
 0x1ad   :  { %v464_v50 = vmax.f32 %v411_v48, 0.0  ;;  %612 = vst [vmem:[#allocation2 + $0x20] sm:$0xff] %v525_v49 }
 0x1af   :  { %574 = vmatmul.f32.gmra.mxu2 %v464_v50 }
 0x1b2   :  { %v413_v52 = vpop.f32.mrf.mxu1  ;;  %v527_v53 = vpop.f32.mrf.mxu2 }
 0x1b3   :  { %v414_v54 = vadd.f32 %v1050_v51, %v413_v52  ;;  %v528_v55 = vadd.f32 %v1088_v25, %v527_v53 }
 0x1b5   :  { %v465_v56 = vmax.f32 %v414_v54, 0.0  ;;  %613 = vst [vmem:[#allocation2 + $0x28] sm:$0xff] %v528_v55 }
 0x1b7   :  { %577 = vmatmul.f32.gmra.mxu2 %v465_v56 }
 0x1ba   :  { %v530_v57 = vpop.f32.mrf.mxu2 }
 0x1bb   :  { %v531_v58 = vadd.f32 %v1088_v25, %v530_v57 }
 0x1bd   :  { %614 = vst [vmem:[#allocation2 + $0x30] sm:$0xff] %v531_v58 }
 0x1c0   :  { %v416_v59 = vpop.f32.mrf.mxu3 }
 0x1c1   :  { %v417_v60 = vadd.f32 %v1050_v51, %v416_v59 }
 0x1c2   :  { %v533_v61 = vpop.f32.mrf.mxu2 }
 0x1c3   :  { %v466_v62 = vmax.f32 %v417_v60, 0.0  ;;  %v534_v63 = vadd.f32 %v1088_v25, %v533_v61 }
 0x1c5   :  { %615 = vst [vmem:[#allocation2 + $0x38] sm:$0xff] %v534_v63  ;;  %580 = vmatmul.f32.vlgmr.msra.gmra.mxu3 %v466_v62 }
 0x1c8   :  { %v419_v0 = vpop.f32.mrf.mxu3 }
 0x1c9   :  { %v420_v1 = vadd.f32 %v1050_v51, %v419_v0 }
 0x1ca   :  { %v536_v2 = vpop.f32.mrf.mxu2 }
 0x1cb   :  { %v467_v3 = vmax.f32 %v420_v1, 0.0  ;;  %v537_v4 = vadd.f32 %v1088_v25, %v536_v2 }
 0x1cd   :  { %616 = vst [vmem:[#allocation2 + $0x40] sm:$0xff] %v537_v4  ;;  %583 = vmatmul.f32.gmra.mxu3 %v467_v3 }
 0x1d0   :  { %v422_v5 = vpop.f32.mrf.mxu3 }
 0x1d1   :  { %v423_v6 = vadd.f32 %v1050_v51, %v422_v5 }
 0x1d2   :  { %v539_v7 = vpop.f32.mrf.mxu2 }
 0x1d3   :  { %v468_v8 = vmax.f32 %v423_v6, 0.0  ;;  %v540_v9 = vadd.f32 %v1088_v25, %v539_v7 }
 0x1d5   :  { %617 = vst [vmem:[#allocation2 + $0x48] sm:$0xff] %v540_v9  ;;  %586 = vmatmul.f32.gmra.mxu3 %v468_v8 }
 0x1d8   :  { %v425_v10 = vpop.f32.mrf.mxu3 }
 0x1d9   :  { %v426_v11 = vadd.f32 %v1050_v51, %v425_v10 }
 0x1da   :  { %v542_v12 = vpop.f32.mrf.mxu2 }
 0x1db   :  { %v469_v13 = vmax.f32 %v426_v11, 0.0  ;;  %v543_v14 = vadd.f32 %v1088_v25, %v542_v12 }
 0x1dd   :  { %618 = vst [vmem:[#allocation2 + $0x50] sm:$0xff] %v543_v14  ;;  %589 = vmatmul.f32.gmra.mxu3 %v469_v13 }
 0x1e0   :  { %v428_v15 = vpop.f32.mrf.mxu3 }
 0x1e1   :  { %v429_v16 = vadd.f32 %v1050_v51, %v428_v15 }
 0x1e2   :  { %v545_v17 = vpop.f32.mrf.mxu2 }
 0x1e3   :  { %v470_v18 = vmax.f32 %v429_v16, 0.0  ;;  %v546_v19 = vadd.f32 %v1088_v25, %v545_v17 }
 0x1e5   :  { %619 = vst [vmem:[#allocation2 + $0x58] sm:$0xff] %v546_v19  ;;  %592 = vmatmul.f32.gmra.mxu3 %v470_v18 }
 0x1e8   :  { %v431_v20 = vpop.f32.mrf.mxu3 }
 0x1e9   :  { %v432_v21 = vadd.f32 %v1050_v51, %v431_v20 }
 0x1ea   :  { %v548_v22 = vpop.f32.mrf.mxu2 }
 0x1eb   :  { %v471_v23 = vmax.f32 %v432_v21, 0.0  ;;  %v549_v24 = vadd.f32 %v1088_v25, %v548_v22 }
 0x1ed   :  { %620 = vst [vmem:[#allocation2 + $0x60] sm:$0xff] %v549_v24  ;;  %595 = vmatmul.f32.gmra.mxu3 %v471_v23 }
 0x1f0   :  { %v434_v26 = vpop.f32.mrf.mxu3 }
 0x1f1   :  { %v435_v33 = vadd.f32 %v1050_v51, %v434_v26 }
 0x1f2   :  { %v551_v27 = vpop.f32.mrf.mxu2 }
 0x1f3   :  { %v472_v28 = vmax.f32 %v435_v33, 0.0  ;;  %v552_v29 = vadd.f32 %v1088_v25, %v551_v27 }
 0x1f5   :  { %621 = vst [vmem:[#allocation2 + $0x68] sm:$0xff] %v552_v29  ;;  %598 = vmatmul.f32.gmra.mxu3 %v472_v28 }
 0x1f8   :  { %v437_v30 = vpop.f32.mrf.mxu3 }
 0x1f9   :  { %v438_v31 = vadd.f32 %v1050_v51, %v437_v30 }
 0x1fa   :  { %v554_v32 = vpop.f32.mrf.mxu2 }
 0x1fb   :  { %v473_v34 = vmax.f32 %v438_v31, 0.0  ;;  %v555_v35 = vadd.f32 %v1088_v25, %v554_v32 }
 0x1fd   :  { %622 = vst [vmem:[#allocation2 + $0x70] sm:$0xff] %v555_v35  ;;  %601 = vmatmul.f32.gmra.mxu3 %v473_v34 }
 0x200   :  { %v440_v36 = vpop.f32.mrf.mxu3 }
 0x201   :  { %v441_v37 = vadd.f32 %v1050_v51, %v440_v36 }
 0x202   :  { %v557_v38 = vpop.f32.mrf.mxu2 }
 0x203   :  { %v474_v39 = vmax.f32 %v441_v37, 0.0  ;;  %v558_v40 = vadd.f32 %v1088_v25, %v557_v38 }
 0x205   :  { %623 = vst [vmem:[#allocation2 + $0x78] sm:$0xff] %v558_v40  ;;  %604 = vmatmul.f32.gmra.mxu3 %v474_v39 }
 0x20a   :  { %v560_v41 = vpop.f32.mrf.mxu2 }
 0x20b   :  { %v561_v42 = vadd.f32 %v1088_v25, %v560_v41 }
 0x20d   :  { %624 = vst [vmem:[#allocation2 + $0x80] sm:$0xff] %v561_v42 }
 0x212   :  { %v563_v43 = vpop.f32.mrf.mxu2 }
 0x213   :  { %v564_v44 = vadd.f32 %v1088_v25, %v563_v43 }
 0x215   :  { %625 = vst [vmem:[#allocation2 + $0x88] sm:$0xff] %v564_v44 }
 0x21a   :  { %v566_v45 = vpop.f32.mrf.mxu2 }
 0x21b   :  { %v567_v46 = vadd.f32 %v1088_v25, %v566_v45 }
 0x21d   :  { %626 = vst [vmem:[#allocation2 + $0x90] sm:$0xff] %v567_v46 }
 0x222   :  { %v569_v47 = vpop.f32.mrf.mxu2 }
 0x223   :  { %v570_v51 = vadd.f32 %v1088_v25, %v569_v47 }
 0x225   :  { %627 = vst [vmem:[#allocation2 + $0x98] sm:$0xff] %v570_v51 }
 0x22a   :  { %v572_v48 = vpop.f32.mrf.mxu2 }
 0x22b   :  { %v573_v49 = vadd.f32 %v1088_v25, %v572_v48 }
 0x22d   :  { %628 = vst [vmem:[#allocation2 + $0xa0] sm:$0xff] %v573_v49 }
 0x232   :  { %v575_v50 = vpop.f32.mrf.mxu2 }
 0x233   :  { %v576_v52 = vadd.f32 %v1088_v25, %v575_v50 }
 0x235   :  { %629 = vst [vmem:[#allocation2 + $0xa8] sm:$0xff] %v576_v52 }
 0x23a   :  { %v578_v53 = vpop.f32.mrf.mxu2 }
 0x23b   :  { %v579_v54 = vadd.f32 %v1088_v25, %v578_v53 }
 0x23d   :  { %630 = vst [vmem:[#allocation2 + $0xb0] sm:$0xff] %v579_v54 }
 0x248   :  { %v581_v55 = vpop.f32.mrf.mxu3 }
 0x249   :  { %v582_v56 = vadd.f32 %v1088_v25, %v581_v55 }
 0x24b   :  { %631 = vst [vmem:[#allocation2 + $0xb8] sm:$0xff] %v582_v56 }
 0x250   :  { %v584_v57 = vpop.f32.mrf.mxu3 }
 0x251   :  { %v585_v58 = vadd.f32 %v1088_v25, %v584_v57 }
 0x253   :  { %632 = vst [vmem:[#allocation2 + $0xc0] sm:$0xff] %v585_v58 }
 0x258   :  { %v587_v59 = vpop.f32.mrf.mxu3 }
 0x259   :  { %v588_v60 = vadd.f32 %v1088_v25, %v587_v59 }
 0x25b   :  { %633 = vst [vmem:[#allocation2 + $0xc8] sm:$0xff] %v588_v60 }
 0x260   :  { %v590_v61 = vpop.f32.mrf.mxu3 }
 0x261   :  { %v591_v62 = vadd.f32 %v1088_v25, %v590_v61 }
 0x263   :  { %634 = vst [vmem:[#allocation2 + $0xd0] sm:$0xff] %v591_v62 }
 0x268   :  { %v593_v63 = vpop.f32.mrf.mxu3 }
 0x269   :  { %v594_v0 = vadd.f32 %v1088_v25, %v593_v63 }
 0x26b   :  { %635 = vst [vmem:[#allocation2 + $0xd8] sm:$0xff] %v594_v0 }
 0x270   :  { %v596_v1 = vpop.f32.mrf.mxu3 }
 0x271   :  { %v597_v2 = vadd.f32 %v1088_v25, %v596_v1 }
 0x273   :  { %636 = vst [vmem:[#allocation2 + $0xe0] sm:$0xff] %v597_v2 }
 0x278   :  { %v599_v3 = vpop.f32.mrf.mxu3 }
 0x279   :  { %v600_v4 = vadd.f32 %v1088_v25, %v599_v3 }
 0x27b   :  { %637 = vst [vmem:[#allocation2 + $0xe8] sm:$0xff] %v600_v4 }
 0x280   :  { %v602_v5 = vpop.f32.mrf.mxu3 }
 0x281   :  { %v603_v6 = vadd.f32 %v1088_v25, %v602_v5 }
 0x283   :  { %638 = vst [vmem:[#allocation2 + $0xf0] sm:$0xff] %v603_v6 }
 0x288   :  { %v605_v7 = vpop.f32.mrf.mxu3 }
 0x289   :  { %v606_v8 = vadd.f32 %v1088_v25, %v605_v7 }
 0x28b   :  { %639 = vst [vmem:[#allocation2 + $0xf8] sm:$0xff] %v606_v8 }
 0x28c   :  { %652 = dma.vmem_to_hbm [thread:$0]  %s645_s8, 4096, %s647_s10, [#allocation3], %s757_s11, %s757_s11, %s758_s12  }
 0x28d   :  { %754 = dma.done.wait [#allocation3], 4096  }
 0x28e   :  { %755 = vsyncadd [#allocation3], 4294963200 }
 0x28f   :  { %657 = vsyncpa [#allocation3], 1 }

</bundles_post_ra>
